<compile_context>
chip_gen: v6e
topology: v6e:2x2x1
jax: 0.10.0
libtpu: 0.0.40
codegen_flags: <defaults>
</compile_context>

<pallas_src>
import functools
import math

import jax
import jax.numpy as jnp
import numpy as np
from jax import lax
from jax.experimental import pallas as pl
from jax.experimental.pallas import tpu as pltpu

# ----------------------------------------------------------------------------
# vocab (same construction as the PyTorch script)
# ----------------------------------------------------------------------------
sentences = [['Hello', 'I', 'am', 'GPT'], ['How', 'are', 'you', 'today'],
             ['I', 'love', 'deep', 'learning'], ['This', 'is', 'a', 'test'],
             ['PyTorch', 'is', 'very', 'powerful'], ['The', 'cat', 'sat', 'here'],
             ['Please', 'show', 'me', 'attention'], ['Learning', 'is', 'fun', 'always'],
             ['Simple', 'data', 'for', 'demo'], ['Transformer', 'models', 'learn', 'patterns']]
vocab = sorted({w for s in sentences for w in s})
word2idx = {w: i for i, w in enumerate(vocab)}
VOCAB_SIZE = len(vocab)        # 37
EMBED_SIZE = 16
SEQ_LEN = 4
PADDED_V = 128                 # lane-dense output width (>= VOCAB_SIZE)


# ----------------------------------------------------------------------------
# Pallas kernel: whole (B*S) batch in one invocation, 3 MXU dots
# ----------------------------------------------------------------------------
def _transformer_kernel(tok_ref, qkv_ref, head_ref, out_ref, *,
                        seq_len, vocab_size, embed_size):
    BS = tok_ref.shape[0]          # B * S flattened tokens (8)
    V = vocab_size
    E = embed_size
    Vp1 = V + 1                    # extra "ones" column selects the bias row

    # --- one-hot selector built directly at (BS, V+1) from SMEM scalars -----
    # column V is all-ones -> picks up the b_qkv row appended to qkv_table,
    # so embedding lookup + QKV projection + bias is ONE MXU dot.
    row_iota = lax.broadcasted_iota(jnp.int32, (BS, Vp1), 0)
    col_iota = lax.broadcasted_iota(jnp.int32, (BS, Vp1), 1)
    sel = col_iota == V
    for i in range(BS):            # BS is static; unrolled, one vreg of VPU work
        sel = sel | ((row_iota == i) & (col_iota == tok_ref[i]))
    one_hot = sel.astype(jnp.float32)                               # (BS, V+1)

    qkv = jnp.dot(one_hot, qkv_ref[...],
                  preferred_element_type=jnp.float32)               # (BS, 3E)
    q = qkv[:, :E]                 # 1/sqrt(E) already folded into Wq, bq
    k = qkv[:, E:2 * E]
    v = qkv[:, 2 * E:3 * E]

    # --- block-diagonal self-attention over the flattened (B*S) axis --------
    # dot_general with contracting dims avoids materializing k.T
    scores = lax.dot_general(q, k, (((1,), (1,)), ((), ())),
                             preferred_element_type=jnp.float32)    # (BS, BS)
    ri = lax.broadcasted_iota(jnp.int32, (BS, BS), 0)
    ci = lax.broadcasted_iota(jnp.int32, (BS, BS), 1)
    if (seq_len & (seq_len - 1)) == 0:
        # row//S == col//S  <=>  (row ^ col) < S  when S is a power of two
        same_seq = (ri ^ ci) < seq_len
    else:
        same_seq = (ri // seq_len) == (ci // seq_len)
    # NOTE: every row always has seq_len unmasked entries, so the -1e30 fill is
    # safe in f32 (no fully-masked row can make the softmax max hit -1e30).
    scores = jnp.where(same_seq, scores, -1e30)

    m = jnp.max(scores, axis=-1, keepdims=True)
    p = jnp.exp(scores - m)
    l = jnp.sum(p, axis=-1, keepdims=True)
    p = p / l                                   # exact divide on a (BS,1) vector
    attn = jnp.dot(p, v, preferred_element_type=jnp.float32)        # (BS, E)

    # --- fused out_proj + fc head (lane-dense, padded to 128) ---------------
    w_head = head_ref[:E, :]                    # (E, 128)
    b_head = head_ref[E:E + 1, :]               # (1, 128) bias row of the slab
    out_ref[...] = jnp.dot(attn, w_head,
                           preferred_element_type=jnp.float32) + b_head


# ----------------------------------------------------------------------------
# host-side, ONE-TIME parameter preparation (hoisted out of the forward path)
# ----------------------------------------------------------------------------
def prepare_params(params):
    E, V = EMBED_SIZE, VOCAB_SIZE
    scale = 1.0 / math.sqrt(E)

    # fused, pre-transposed QKV with attention scale folded into Wq / bq
    w_qkv_t = jnp.concatenate(
        [(scale * params["wq"]).T, params["wk"].T, params["wv"].T], axis=1)   # (E, 3E)
    b_qkv = jnp.concatenate(
        [scale * params["bq"], params["bk"], params["bv"]], axis=1)           # (1, 3E)
    # fold the embedding table into the QKV projection
    qkv_table = params["embedding"] @ w_qkv_t                                 # (V, 3E)
    qkv_slab = jnp.concatenate([qkv_table, b_qkv], axis=0)                    # (V+1, 3E)

    # fold out_proj into the fc head (no nonlinearity between them) + lane pad
    wfc_t = jnp.zeros((E, PADDED_V), jnp.float32).at[:, :V].set(params["fc_w"].T)
    bfc = jnp.zeros((1, PADDED_V), jnp.float32).at[:, :V].set(params["fc_b"])
    w_head = params["wo"].T @ wfc_t                                           # (E, 128)
    b_head = params["bo"] @ wfc_t + bfc                                       # (1, 128)
    head_slab = jnp.concatenate([w_head, b_head], axis=0)                     # (E+1, 128)

    return {"qkv_slab": qkv_slab, "head_slab": head_slab}


# ----------------------------------------------------------------------------
# forward: a single pallas_call (3 inputs: SMEM tokens + 2 VMEM weight slabs)
# ----------------------------------------------------------------------------
def mini_transformer_forward(tokens, prep):
    B, S = tokens.shape
    BS = B * S
    tok_flat = tokens.reshape(BS).astype(jnp.int32)

    logits_padded = pl.pallas_call(
        functools.partial(_transformer_kernel, seq_len=S,
                          vocab_size=VOCAB_SIZE, embed_size=EMBED_SIZE),
        out_shape=jax.ShapeDtypeStruct((BS, PADDED_V), jnp.float32),
        in_specs=[pl.BlockSpec(memory_space=pltpu.MemorySpace.SMEM),   # tokens
                  pl.BlockSpec(memory_space=pltpu.MemorySpace.VMEM),   # qkv slab
                  pl.BlockSpec(memory_space=pltpu.MemorySpace.VMEM)],  # head slab
        out_specs=pl.BlockSpec(memory_space=pltpu.MemorySpace.VMEM),
    )(tok_flat, prep["qkv_slab"], prep["head_slab"])

    # slice back to the module's (B, S, vocab) output; downstream consumers
    # could instead keep the padded lane-dense (BS, 128) layout.
    return logits_padded.reshape(B, S, PADDED_V)[:, :, :VOCAB_SIZE]


# ----------------------------------------------------------------------------
# pure-JAX reference (mirrors PyTorch MultiheadAttention with num_heads=1)
# ----------------------------------------------------------------------------
def reference_forward(tokens, p):
    x = jnp.take(p["embedding"], tokens, axis=0)
    q = x @ p["wq"].T + p["bq"][0]
    k = x @ p["wk"].T + p["bk"][0]
    v = x @ p["wv"].T + p["bv"][0]
    s = (q @ jnp.swapaxes(k, -1, -2)) / math.sqrt(EMBED_SIZE)
    a = jax.nn.softmax(s, axis=-1)
    o = (a @ v) @ p["wo"].T + p["bo"][0]
    return o @ p["fc_w"].T + p["fc_b"][0]


# ----------------------------------------------------------------------------
# deterministic parameter init (synthetic; no checkpoint load)
# ----------------------------------------------------------------------------
def init_params(key):
    ks = jax.random.split(key, 8)
    E, V = EMBED_SIZE, VOCAB_SIZE
    return {
        "embedding": jax.random.normal(ks[0], (V, E), jnp.float32),
        "wq": 0.1 * jax.random.normal(ks[1], (E, E), jnp.float32),
        "wk": 0.1 * jax.random.normal(ks[2], (E, E), jnp.float32),
        "wv": 0.1 * jax.random.normal(ks[3], (E, E), jnp.float32),
        "bq": 0.01 * jax.random.normal(ks[4], (1, E), jnp.float32),
        "bk": jnp.zeros((1, E), jnp.float32),
        "bv": jnp.zeros((1, E), jnp.float32),
        "wo": 0.1 * jax.random.normal(ks[5], (E, E), jnp.float32),
        "bo": 0.01 * jax.random.normal(ks[6], (1, E), jnp.float32),
        "fc_w": 0.1 * jax.random.normal(ks[7], (V, E), jnp.float32),
        "fc_b": jnp.zeros((1, V), jnp.float32),
    }


if __name__ == "__main__":
    key = jax.random.PRNGKey(0)
    params = init_params(key)

    # one-time host-side weight preparation (cached; NOT on the forward path)
    prep = {k: jax.block_until_ready(v) for k, v in prepare_params(params).items()}

    # small batch of 2 sentences, seq_len = 4 (as the module's forward implies)
    tok_np = np.array([[word2idx[w] for w in sentences[0]],
                       [word2idx[w] for w in sentences[1]]], dtype=np.int32)
    tokens = jnp.asarray(tok_np)                                    # (2, 4)

    out = mini_transformer_forward(tokens, prep)
    out = jax.block_until_ready(out)

    ref = reference_forward(tokens, params)
    assert out.shape == (2, SEQ_LEN, VOCAB_SIZE)
    # small margin for MXU f32 pass precision / host-side weight-fold rounding
    np.testing.assert_allclose(np.asarray(out), np.asarray(ref), rtol=2e-3, atol=2e-3)

    print("KERNEL_OK")
</pallas_src>

<mosaic_0001>
module attributes {stable_mosaic.version = 11 : i64} {
  func.func @_transformer_kernel(%arg0: memref<8xi32, #tpu.memory_space<smem>>, %arg1: memref<38x48xf32, #tpu.memory_space<vmem>>, %arg2: memref<17x128xf32, #tpu.memory_space<vmem>>, %arg3: memref<8x128xf32, #tpu.memory_space<vmem>>) attributes {dimension_semantics = [], scalar_prefetch = 0 : i64, scratch_operands = 0 : i64, tpu.core_type = #tpu.core_type<tc>} {
    %0 = tpu.iota {dimensions = array<i32: 0>} : vector<8x38xi32>
    %1 = tpu.iota {dimensions = array<i32: 1>} : vector<8x38xi32>
    %c37_i32 = arith.constant 37 : i32
    %2 = vector.broadcast %c37_i32 : i32 to vector<8x38xi32>
    %3 = arith.cmpi eq, %1, %2 : vector<8x38xi32>
    %c0_i32 = arith.constant 0 : i32
    %4 = vector.broadcast %c0_i32 : i32 to vector<8x38xi32>
    %5 = arith.cmpi eq, %0, %4 : vector<8x38xi32>
    %c0 = arith.constant 0 : index
    %6 = memref.load %arg0[%c0] : memref<8xi32, #tpu.memory_space<smem>>
    %7 = vector.broadcast %6 : i32 to vector<8x38xi32>
    %8 = arith.cmpi eq, %1, %7 : vector<8x38xi32>
    %9 = arith.andi %5, %8 : vector<8x38xi1>
    %10 = arith.ori %3, %9 : vector<8x38xi1>
    %c1_i32 = arith.constant 1 : i32
    %11 = vector.broadcast %c1_i32 : i32 to vector<8x38xi32>
    %12 = arith.cmpi eq, %0, %11 : vector<8x38xi32>
    %c1 = arith.constant 1 : index
    %13 = memref.load %arg0[%c1] : memref<8xi32, #tpu.memory_space<smem>>
    %14 = vector.broadcast %13 : i32 to vector<8x38xi32>
    %15 = arith.cmpi eq, %1, %14 : vector<8x38xi32>
    %16 = arith.andi %12, %15 : vector<8x38xi1>
    %17 = arith.ori %10, %16 : vector<8x38xi1>
    %c2_i32 = arith.constant 2 : i32
    %18 = vector.broadcast %c2_i32 : i32 to vector<8x38xi32>
    %19 = arith.cmpi eq, %0, %18 : vector<8x38xi32>
    %c2 = arith.constant 2 : index
    %20 = memref.load %arg0[%c2] : memref<8xi32, #tpu.memory_space<smem>>
    %21 = vector.broadcast %20 : i32 to vector<8x38xi32>
    %22 = arith.cmpi eq, %1, %21 : vector<8x38xi32>
    %23 = arith.andi %19, %22 : vector<8x38xi1>
    %24 = arith.ori %17, %23 : vector<8x38xi1>
    %c3_i32 = arith.constant 3 : i32
    %25 = vector.broadcast %c3_i32 : i32 to vector<8x38xi32>
    %26 = arith.cmpi eq, %0, %25 : vector<8x38xi32>
    %c3 = arith.constant 3 : index
    %27 = memref.load %arg0[%c3] : memref<8xi32, #tpu.memory_space<smem>>
    %28 = vector.broadcast %27 : i32 to vector<8x38xi32>
    %29 = arith.cmpi eq, %1, %28 : vector<8x38xi32>
    %30 = arith.andi %26, %29 : vector<8x38xi1>
    %31 = arith.ori %24, %30 : vector<8x38xi1>
    %c4_i32 = arith.constant 4 : i32
    %32 = vector.broadcast %c4_i32 : i32 to vector<8x38xi32>
    %33 = arith.cmpi eq, %0, %32 : vector<8x38xi32>
    %c4 = arith.constant 4 : index
    %34 = memref.load %arg0[%c4] : memref<8xi32, #tpu.memory_space<smem>>
    %35 = vector.broadcast %34 : i32 to vector<8x38xi32>
    %36 = arith.cmpi eq, %1, %35 : vector<8x38xi32>
    %37 = arith.andi %33, %36 : vector<8x38xi1>
    %38 = arith.ori %31, %37 : vector<8x38xi1>
    %c5_i32 = arith.constant 5 : i32
    %39 = vector.broadcast %c5_i32 : i32 to vector<8x38xi32>
    %40 = arith.cmpi eq, %0, %39 : vector<8x38xi32>
    %c5 = arith.constant 5 : index
    %41 = memref.load %arg0[%c5] : memref<8xi32, #tpu.memory_space<smem>>
    %42 = vector.broadcast %41 : i32 to vector<8x38xi32>
    %43 = arith.cmpi eq, %1, %42 : vector<8x38xi32>
    %44 = arith.andi %40, %43 : vector<8x38xi1>
    %45 = arith.ori %38, %44 : vector<8x38xi1>
    %c6_i32 = arith.constant 6 : i32
    %46 = vector.broadcast %c6_i32 : i32 to vector<8x38xi32>
    %47 = arith.cmpi eq, %0, %46 : vector<8x38xi32>
    %c6 = arith.constant 6 : index
    %48 = memref.load %arg0[%c6] : memref<8xi32, #tpu.memory_space<smem>>
    %49 = vector.broadcast %48 : i32 to vector<8x38xi32>
    %50 = arith.cmpi eq, %1, %49 : vector<8x38xi32>
    %51 = arith.andi %47, %50 : vector<8x38xi1>
    %52 = arith.ori %45, %51 : vector<8x38xi1>
    %c7_i32 = arith.constant 7 : i32
    %53 = vector.broadcast %c7_i32 : i32 to vector<8x38xi32>
    %54 = arith.cmpi eq, %0, %53 : vector<8x38xi32>
    %c7 = arith.constant 7 : index
    %55 = memref.load %arg0[%c7] : memref<8xi32, #tpu.memory_space<smem>>
    %56 = vector.broadcast %55 : i32 to vector<8x38xi32>
    %57 = arith.cmpi eq, %1, %56 : vector<8x38xi32>
    %58 = arith.andi %54, %57 : vector<8x38xi1>
    %59 = arith.ori %52, %58 : vector<8x38xi1>
    %60 = arith.extui %59 : vector<8x38xi1> to vector<8x38xi32>
    %61 = arith.sitofp %60 : vector<8x38xi32> to vector<8x38xf32>
    %c0_0 = arith.constant 0 : index
    %c0_1 = arith.constant 0 : index
    %62 = vector.load %arg1[%c0_0, %c0_1] : memref<38x48xf32, #tpu.memory_space<vmem>>, vector<38x48xf32>
    %cst = arith.constant dense<0.000000e+00> : vector<8x48xf32>
    %63 = tpu.matmul %61, %62, %cst {dimension_numbers = #tpu.dot_dimension_numbers<[1], [0], [0], [1], [0, 0, 1, 1], [], []>} : vector<8x38xf32>, vector<38x48xf32>, vector<8x48xf32> -> vector<8x48xf32>
    %64 = vector.extract_strided_slice %63 {offsets = [0, 0], sizes = [8, 16], strides = [1, 1]} : vector<8x48xf32> to vector<8x16xf32>
    %65 = vector.extract_strided_slice %63 {offsets = [0, 16], sizes = [8, 16], strides = [1, 1]} : vector<8x48xf32> to vector<8x16xf32>
    %66 = vector.extract_strided_slice %63 {offsets = [0, 32], sizes = [8, 16], strides = [1, 1]} : vector<8x48xf32> to vector<8x16xf32>
    %cst_2 = arith.constant dense<0.000000e+00> : vector<8x8xf32>
    %67 = tpu.matmul %64, %65, %cst_2 {dimension_numbers = #tpu.dot_dimension_numbers<[1], [1], [0], [0], [0, 0, 1, 0], [], []>} : vector<8x16xf32>, vector<8x16xf32>, vector<8x8xf32> -> vector<8x8xf32>
    %68 = tpu.iota {dimensions = array<i32: 0>} : vector<8x8xi32>
    %69 = tpu.iota {dimensions = array<i32: 1>} : vector<8x8xi32>
    %70 = arith.xori %68, %69 : vector<8x8xi32>
    %c4_i32_3 = arith.constant 4 : i32
    %71 = vector.broadcast %c4_i32_3 : i32 to vector<8x8xi32>
    %72 = arith.cmpi slt, %70, %71 : vector<8x8xi32>
    %cst_4 = arith.constant -1.000000e+30 : f32
    %73 = vector.broadcast %cst_4 : f32 to vector<8x8xf32>
    %74 = arith.select %72, %67, %73 : vector<8x8xi1>, vector<8x8xf32>
    %cst_5 = arith.constant dense<0xFF800000> : vector<8xf32>
    %75 = vector.multi_reduction <maximumf>, %74, %cst_5 [1] : vector<8x8xf32> to vector<8xf32>
    %76 = vector.shape_cast %75 : vector<8xf32> to vector<8x1xf32>
    %77 = vector.broadcast %76 : vector<8x1xf32> to vector<8x8xf32>
    %78 = arith.subf %74, %77 : vector<8x8xf32>
    %79 = math.exp %78 : vector<8x8xf32>
    %cst_6 = arith.constant dense<0.000000e+00> : vector<8xf32>
    %80 = vector.multi_reduction <add>, %79, %cst_6 [1] : vector<8x8xf32> to vector<8xf32>
    %81 = vector.shape_cast %80 : vector<8xf32> to vector<8x1xf32>
    %82 = vector.broadcast %81 : vector<8x1xf32> to vector<8x8xf32>
    %83 = arith.divf %79, %82 : vector<8x8xf32>
    %cst_7 = arith.constant dense<0.000000e+00> : vector<8x16xf32>
    %84 = tpu.matmul %83, %66, %cst_7 {dimension_numbers = #tpu.dot_dimension_numbers<[1], [0], [0], [1], [0, 0, 1, 1], [], []>} : vector<8x8xf32>, vector<8x16xf32>, vector<8x16xf32> -> vector<8x16xf32>
    %c0_8 = arith.constant 0 : index
    %c0_9 = arith.constant 0 : index
    %85 = vector.load %arg2[%c0_8, %c0_9] : memref<17x128xf32, #tpu.memory_space<vmem>>, vector<16x128xf32>
    %c16 = arith.constant 16 : index
    %c0_10 = arith.constant 0 : index
    %86 = vector.load %arg2[%c16, %c0_10] : memref<17x128xf32, #tpu.memory_space<vmem>>, vector<1x128xf32>
    %cst_11 = arith.constant dense<0.000000e+00> : vector<8x128xf32>
    %87 = tpu.matmul %84, %85, %cst_11 {dimension_numbers = #tpu.dot_dimension_numbers<[1], [0], [0], [1], [0, 0, 1, 1], [], []>} : vector<8x16xf32>, vector<16x128xf32>, vector<8x128xf32> -> vector<8x128xf32>
    %88 = vector.broadcast %86 : vector<1x128xf32> to vector<8x128xf32>
    %89 = arith.addf %87, %88 : vector<8x128xf32>
    %c0_12 = arith.constant 0 : index
    %c0_13 = arith.constant 0 : index
    %90 = vector.load %arg3[%c0_12, %c0_13] : memref<8x128xf32, #tpu.memory_space<vmem>>, vector<8x128xf32>
    tpu.vector_store %arg3[%c0_12, %c0_13], %89 {strides = array<i32>} : memref<8x128xf32, #tpu.memory_space<vmem>>, vector<8x128xf32>,
    return
  }
}

</mosaic_0001>

<bundles_post_ra>
// kernel: tpu_custom_call.1
= control target key start
LH: loop header
LB: loop body
LE: loop exit
PB: predicated region body
PF: predicated region fallthrough
CT: control target
= control target key end

     0   :  { %8 = vsyncpa [#allocation5], 0  ;;  %s705_s0 = inlined_call_operand.hbm [shape: s32[8], index: 0, kind: input, shape index: {}]   ;;  %s706_s1 = inlined_call_operand.hbm [shape: f32[38,48], index: 1, kind: input, shape index: {}]   ;;  %s707_s2 = inlined_call_operand.hbm [shape: f32[17,128], index: 2, kind: input, shape index: {}]   ;;  %s708_s3 = inlined_call_operand.hbm [shape: f32[8,128], index: 3, kind: output, shape index: {}]  }
   0x1   :  { %9 = vsyncpa [#allocation3], 0 }
   0x2   :  { %10 = vsyncpa [#allocation8], 0 }
   0x3   :  { %11 = vsyncpa [#allocation4], 0  ;;  %s607_s12 = smov [#allocation2]   ;;  %s608_s15 = smov [#allocation6]  }
   0x4   :  { %19 = dma.hbm_to_smem %s705_s0, 16, %s607_s12, [#allocation5]  }
   0x5   :  { %s25_s16 = sshll.u32 %s608_s15, 4  ;;  %s26_s16 = int_to_ptr.vmem [resolvable:$true] %s25_s16 }
   0x6   :  { %s547_s17 = scalar_lea.vmem %s26_s16, 640  ;;  %p552_p1 = scmp.lt.s32.totalorder %s26_s16, %s26_s16 }
   0x7   :  { %p548_p0 = scmp.ne.s32.totalorder %s26_s16, %s547_s17  ;;  %p553_p2 = scmp.lt.s32.totalorder %s547_s17, %s547_s17 }
   0x9   :  { %p554_p3 = por %p553_p2, %p552_p1 }
   0xb   :  { %p555_p4 = pnand %p554_p3, %p548_p0 }
   0xd   :  { %558 = shalt.err (!%p555_p4)
}
   0xe   :  { %s609_s18 = smov 128   ;;  %s610_s19 = smov 8  }
   0xf   :  { %31 = dma.hbm_to_vmem [thread:$0]  %s706_s1, 640, %s26_s16, [#allocation3], %s609_s18, %s609_s18, %s610_s19  }
  0x10   :  { %s611_s22 = smov [#allocation7]  }
  0x11   :  { %s37_s23 = sshll.u32 %s611_s22, 4  ;;  %s38_s23 = int_to_ptr.vmem [resolvable:$true] %s37_s23 }
  0x12   :  { %s567_s0 = scalar_lea.vmem %s38_s23, 384  ;;  %p572_p6 = scmp.lt.s32.totalorder %s38_s23, %s38_s23 }
  0x13   :  { %p568_p5 = scmp.ne.s32.totalorder %s38_s23, %s567_s0  ;;  %p573_p7 = scmp.lt.s32.totalorder %s567_s0, %s567_s0 }
  0x15   :  { %p574_p8 = por %p573_p7, %p572_p6 }
  0x17   :  { %p575_p9 = pnand %p574_p8, %p568_p5 }
  0x19   :  { %578 = shalt.err (!%p575_p9)
}
  0x1a   :  { %43 = dma.hbm_to_vmem [thread:$0]  %s707_s2, 384, %s38_s23, [#allocation8], %s609_s18, %s609_s18, %s610_s19  }
  0x1b   :  { %599 = dma.done.wait [#allocation5], 16  }
  0x1c   :  { %600 = vsyncadd [#allocation5], 4294967280 }
  0x1d   :  { %601 = dma.done.wait [#allocation3], 640  }
  0x1e   :  { %602 = vsyncadd [#allocation3], 4294966656 }
  0x1f   :  { %603 = dma.done.wait [#allocation8], 384  }
  0x20   :  { %604 = vsyncadd [#allocation8], 4294966912 }
  0x21   :  { %53 = sfence }
  0x22   :  { %v113_v0 = vld [vmem:[#allocation6 + $0x20] sm:$0x3f]  ;;  %vm118_vm0 = vcmask 1045504   ;;  %v54_v1 = vlaneseq  ;;  %v612_v2 = vmov 0.0   ;;  %v112_v3 = vld [vmem:[#allocation6 + $0x18] sm:$0xff]  ;;  %s60_s1 = sld [smem:[#allocation2]] }
  0x23   :  { %487 = vmatprep.subr.mxu0 %v612_v2  ;;  %500 = vmatprep.subr.mxu1 %v612_v2  ;;  %vm709_vm1 = vmmov 0   ;;  %s459_s2 = sld [smem:[#allocation2 + $0x1]]  ;;  %v111_v5 = vld [vmem:[#allocation6 + $0x10] sm:$0xff]  ;;  %v110_v7 = vld [vmem:[#allocation6 + $0x8] sm:$0xff]  ;;  %v109_v8 = vld [vmem:[#allocation6] sm:$0xff]  ;;  %s614_s5 = smov 112  }
  0x24   :  { %488 = vmatpush3.msk.msra.mxu0 %vm118_vm0, %v113_v0  ;;  %497 = vmatprep.mubr.msk.f32.mxu0 %vm709_vm1, %v612_v2  ;;  %v650_v4 = vshrl.u32 %v54_v1, 7  ;;  %v653_v6 = vand.u32 127, %v54_v1  ;;  %s460_s26 = sld [smem:[#allocation2 + $0x2]]  ;;  %s615_s6 = smov 96   ;;  %v362_v35 = vld [vmem:[#allocation7 + $0x8] sm:$0xff]  ;;  %v361_v36 = vld [vmem:[#allocation7] sm:$0xff] }
  0x25   :  { %489 = vmatprep.subr.mxu0 %v612_v2  ;;  %502 = vmatprep.mubr.msk.f32.mxu1 %vm709_vm1, %v612_v2  ;;  %s461_s27 = sld [smem:[#allocation2 + $0x3]]  ;;  %v472_v39 = vld [vmem:[#allocation7 + $0x10] ss:$0 sm:$0xff]  ;;  %s616_s7 = smov [#allocation9]  }
  0x26   :  { %490 = vmatpush3.msra.mxu0 %v112_v3  ;;  %s658_s28 = sld [smem:[#allocation2 + $0x4]]  ;;  %vm59_vm2 = vcmp.eq.s32.totalorder %v650_v4, 0  ;;  %vm58_vm3 = vcmp.eq.s32.totalorder %v653_v6, 37  ;;  %vm65_vm5 = vcmp.eq.s32.totalorder %v650_v4, 1  ;;  %vm71_vm9 = vcmp.eq.s32.totalorder %v650_v4, 2  ;;  %s448_s8 = sshll.u32 %s616_s7, 4  ;;  %s449_s8 = int_to_ptr.vmem [resolvable:$true] %s448_s8 }
  0x27   :  { %491 = vmatprep.subr.mxu0 %v612_v2  ;;  %s661_s29 = sld [smem:[#allocation2 + $0x5]]  ;;  %vm77_vm13 = vcmp.eq.s32.totalorder %v650_v4, 3  ;;  %vm89_vm1 = vcmp.eq.s32.totalorder %v650_v4, 5  ;;  %v270_v21 = vxor.u32 %v653_v6, %v650_v4  ;;  %s579_s9 = scalar_lea.vmem %s449_s8, 128 }
  0x28   :  { %492 = vmatpush3.msra.mxu0 %v111_v5  ;;  %v61_v9 = vstv %s60_s1  ;;  %s665_s30 = sld [smem:[#allocation2 + $0x6]]  ;;  %p580_p10 = scmp.ne.s32.totalorder %s449_s8, %s579_s9 }
  0x29   :  { %493 = vmatprep.subr.mxu0 %v612_v2  ;;  %vm62_vm4 = vcmp.eq.s32.totalorder %v653_v6, %v61_v9  ;;  %v67_v10 = vstv %s459_s2  ;;  %s465_s4 = sld [smem:[#allocation2 + $0x7]]  ;;  %p584_p11 = scmp.lt.s32.totalorder %s449_s8, %s449_s8 }
  0x2a   :  { %494 = vmatpush3.msra.mxu0 %v110_v7  ;;  %vm63_vm6 = vmand %vm59_vm2, %vm62_vm4  ;;  %vm68_vm7 = vcmp.eq.s32.totalorder %v653_v6, %v67_v10  ;;  %v73_v11 = vstv %s460_s26  ;;  %vm83_vm2 = vcmp.eq.s32.totalorder %v650_v4, 4  ;;  %p585_p12 = scmp.lt.s32.totalorder %s579_s9, %s579_s9 }
  0x2b   :  { %495 = vmatprep.subr.mxu0 %v612_v2  ;;  %vm64_vm8 = vmor %vm58_vm3, %vm63_vm6  ;;  %vm74_vm10 = vcmp.eq.s32.totalorder %v653_v6, %v73_v11  ;;  %v79_v12 = vstv %s461_s27 }
  0x2c   :  { %496 = vmatpush3.msra.mxu0 %v109_v8  ;;  %vm69_vm11 = vmand %vm65_vm5, %vm68_vm7  ;;  %v85_v13 = vstv %s658_s28  ;;  %vm80_vm14 = vcmp.eq.s32.totalorder %v653_v6, %v79_v12  ;;  %p586_p13 = por %p585_p12, %p584_p11 }
  0x2d   :  { %vm70_vm12 = vmor %vm64_vm8, %vm69_vm11  ;;  %v91_v14 = vstv %s661_s29  ;;  %vm86_vm4 = vcmp.eq.s32.totalorder %v653_v6, %v85_v13  ;;  %vm95_vm11 = vcmp.eq.s32.totalorder %v650_v4, 6 }
  0x2e   :  { %vm75_vm15 = vmand %vm71_vm9, %vm74_vm10  ;;  %v97_v15 = vstv %s665_s30  ;;  %vm92_vm5 = vcmp.eq.s32.totalorder %v653_v6, %v91_v14  ;;  %p587_p0 = pnand %p586_p13, %p580_p10 }
  0x2f   :  { %vm76_vm0 = vmor %vm70_vm12, %vm75_vm15  ;;  %v103_v16 = vstv %s465_s4  ;;  %vm98_vm9 = vcmp.eq.s32.totalorder %v653_v6, %v97_v15  ;;  %vm101_vm15 = vcmp.eq.s32.totalorder %v650_v4, 7 }
  0x30   :  { %vm81_vm3 = vmand %vm77_vm13, %vm80_vm14  ;;  %vm104_vm13 = vcmp.eq.s32.totalorder %v653_v6, %v103_v16 }
  0x31   :  { %vm82_vm6 = vmor %vm76_vm0, %vm81_vm3 }
  0x32   :  { %vm87_vm7 = vmand %vm83_vm2, %vm86_vm4  ;;  %vm114_vm2 = vcmask 310272  }
  0x33   :  { %vm88_vm8 = vmor %vm82_vm6, %vm87_vm7  ;;  %vm195_vm6 = vcmask 130048   ;;  %vm273_vm7 = vcmask 64512  }
  0x34   :  { %vm93_vm10 = vmand %vm89_vm1, %vm92_vm5  ;;  %vm711_vm1 = vmmov 0   ;;  %vm271_vm5 = vcmp.lt.s32.totalorder %v270_v21, 4 }
  0x35   :  { %vm94_vm12 = vmor %vm88_vm8, %vm93_vm10 }
  0x36   :  { %vm99_vm14 = vmand %vm95_vm11, %vm98_vm9 }
  0x37   :  { %vm100_vm0 = vmor %vm94_vm12, %vm99_vm14 }
  0x38   :  { %vm105_vm3 = vmand %vm101_vm15, %vm104_vm13 }
  0x39   :  { %vm106_vm4 = vmor %vm100_vm0, %vm105_vm3 }
  0x3a   :  { %v466_v17 = vsel %vm106_vm4, 1.0, %v612_v2 }
  0x3b   :  { %498 = vmatmul.mubr.msk.f32.vlgmr.msra.gmra.mxu0 %vm114_vm2, %v466_v17 }
  0xfb   :  { %v188_v18 = vpop.f32.mrf.mxu0 }
  0xfc   :  { %193 = vrot.lane.b32.xlu0 %v188_v18, %s614_s5 }
  0xfd   :  { %v499_v19 = vpop.f32.mrf.mxu0 }
 0x16e   :  { %v194_v20 = vpop.permute.xlu0 %193 }
 0x16f   :  { %501 = vmatpush3.xpose.msk.msra.mxu1 %vm195_vm6, %v194_v20 }
 0x170   :  { %505 = vmatprep.subr.mxu1 %v612_v2 }
 0x172   :  { %503 = vmatmul.mubr.msk.f32.vlgmr.msra.gmra.mxu1 %vm195_vm6, %v188_v18 }
 0x173   :  { %507 = vmatprep.mubr.msk.f32.mxu1 %vm711_vm1, %v612_v2 }
 0x232   :  { %v266_v22 = vpop.f32.mrf.mxu1 }
 0x233   :  { %v272_v23 = vsel %vm271_vm5, %v266_v22, -1e+30 }
 0x234   :  { %v504_v24 = vpop.f32.mrf.mxu1  ;;  %v274_v25 = vsel %vm273_vm7, %v272_v23, -inf }
 0x235   :  { %275 = vmax.xlane.f32.xlu0 %v274_v25 }
 0x2be   :  { %v276_v26 = vpop.xlane.xlu0 %275 }
 0x2bf   :  { %v277_v27 = vsub.f32 %v272_v23, %v276_v26 }
 0x2c1   :  { %v278_v28 = vmul.f32 1.442695, %v277_v27 }
 0x2c3   :  { %527 = vpow2.f32 %v278_v28 }
 0x2d0   :  { %v528_v29 = vpop.eup %527 }
 0x2d1   :  { %v280_v30 = vsel %vm273_vm7, %v528_v29, 0.0 }
 0x2d2   :  { %281 = vadd.xlane.f32.xlu1 %v280_v30 }
 0x2e3   :  { %285 = vrot.lane.b32.xlu1 %v188_v18, %s615_s6 }
 0x35b   :  { %v282_v31 = vpop.xlane.xlu1 %281 }
 0x35c   :  { %529 = vrcp.f32 %v282_v31 }
 0x35f   :  { %v286_v32 = vpop.permute.xlu1 %285 }
 0x360   :  { %506 = vmatpush3.msra.mxu1 %v286_v32 }
 0x361   :  { %510 = vmatprep.subr.mxu1 %v612_v2 }
 0x369   :  { %v530_v33 = vpop.eup %529 }
 0x36a   :  { %v284_v34 = vmul.f32 %v530_v33, %v528_v29 }
 0x36c   :  { %508 = vmatmul.mubr.msk.f32.vlgmr.msra.gmra.mxu1 %vm273_vm7, %v284_v34 }
 0x36d   :  { %511 = vmatpush3.msra.mxu1 %v362_v35  ;;  %514 = vmatprep.mubr.msk.f32.mxu1 %vm711_vm1, %v612_v2 }
 0x36e   :  { %512 = vmatprep.subr.mxu1 %v612_v2 }
 0x36f   :  { %513 = vmatpush3.msra.mxu1 %v361_v36 }
 0x42c   :  { %v357_v37 = vpop.f32.mrf.mxu1 }
 0x42d   :  { %515 = vmatmul.mubr.msk.f32.vlgmr.msra.gmra.mxu1 %vm195_vm6, %v357_v37 }
 0x42e   :  { %v509_v38 = vpop.f32.mrf.mxu1 }
 0x4ed   :  { %v437_v40 = vpop.f32.mrf.mxu1 }
 0x4ee   :  { %v438_v41 = vadd.f32 %v472_v39, %v437_v40 }
 0x4ef   :  { %v516_v42 = vpop.f32.mrf.mxu1 }
 0x4f0   :  { %441 = vst [vmem:[#allocation9] sm:$0xff] %v438_v41 }
 0x4f1   :  { %590 = shalt.err (!%p587_p0)
}
 0x4f2   :  { %451 = dma.vmem_to_hbm [thread:$0]  %s449_s8, 128, %s708_s3, [#allocation4]  }
 0x4f3   :  { %605 = dma.done.wait [#allocation4], 128  }
 0x4f4   :  { %606 = vsyncadd [#allocation4], 4294967168 }
 0x4f5   :  { %455 = vsyncpa [#allocation3], 1 }
 0x4f6   :  { %456 = vsyncpa [#allocation8], 1 }
 0x4f7   :  { %457 = vsyncpa [#allocation4], 1 }
 0x4f8   :  { %458 = vsyncpa [#allocation5], 1 }

</bundles_post_ra>
